<compile_context>
chip_gen: v6e
topology: v6e:2x2x1
jax: 0.10.0
libtpu: 0.0.40
codegen_flags: <defaults>
</compile_context>

<pallas_src>
import numpy as np
import jax
import jax.numpy as jnp
from jax.experimental import pallas as pl
from jax.experimental.pallas import tpu as pltpu


# -----------------------------------------------------------------------------
# Kernel factory: one grid step processes a block of `b_imgs` images.
# -----------------------------------------------------------------------------
def _make_kernel(b_imgs, cin, cg, height, width):
    hh, ww = height // 2, width // 2
    hw = hh * ww
    cc = cin + cg

    def kernel(z_ref, x_ref, w_ref, uh_ref, uwt_ref, out_ref):
        # Packed weight slab: [ wt | wp | wpsi | bt+bp | bpsi ]  (cin, cc+3)
        wcat = w_ref[...]
        wtp = wcat[:, :cc]                       # (cin, cc)  fused theta/phi weight
        wpsi = wcat[:, cc:cc + 1]                # (cin, 1)
        btp = wcat[:, cc + 1:cc + 2]             # (cin, 1)   combined bias bt+bp
        bpsi = wcat[0:1, cc + 2:cc + 3]          # (1, 1)
        uh = uh_ref[...]                         # (height, hh)  height interp
        uwt = uwt_ref[...]                       # (ww, width)   width interp (uw^T)

        for b in range(b_imgs):                  # static unroll; b_imgs <= 8
            # ---- gating branch at half resolution (lane dim = h*w) ---------
            z_b = z_ref[b * cc:(b + 1) * cc, :]                       # (cc, hw)
            add = jnp.maximum(
                jnp.dot(wtp, z_b, preferred_element_type=jnp.float32) + btp,
                0.0)                                                   # (cin, hw)
            # psi: cin -> 1 channel as a VPU multiply + small sublane reduce
            # (avoids an M=1 MXU matmul).
            psi = jnp.sum(add * wpsi, axis=0, keepdims=True) + bpsi    # (1, hw)
            # sigmoid via EUP exp + approx EUP reciprocal.
            sig = pl.reciprocal(1.0 + jnp.exp(-psi), approx=True)      # (1, hw)

            # ---- separable bilinear 2x upsample (align_corners=True) -------
            # Height interpolation fused with the (1, hw) -> (hh, ww)
            # unflatten: row p of the half-res map is the lane slice
            # sig[:, p*ww:(p+1)*ww]; accumulate uh-weighted rank-1 outer
            # products (pure VPU, no in-kernel reshape/relayout needed).
            t = uh[:, 0:1] * sig[:, 0:ww]                              # (height, ww)
            for p in range(1, hh):
                t = t + uh[:, p:p + 1] * sig[:, p * ww:(p + 1) * ww]
            gate = jnp.dot(t, uwt,
                           preferred_element_type=jnp.float32)         # (height, width)

            # ---- gate the encoder features (broadcast over channels) -------
            x_b = x_ref[b * cin:(b + 1) * cin, :, :]                   # (cin, H, W)
            out_ref[b * cin:(b + 1) * cin, :, :] = (
                x_b * gate[None, :, :]).astype(out_ref.dtype)

    return kernel


# -----------------------------------------------------------------------------
# Host-side helpers
# -----------------------------------------------------------------------------
def _interp_matrix_align_corners(n_out, n_in):
    """(n_out, n_in) 1-D bilinear interpolation weights, align_corners=True."""
    m = np.zeros((n_out, n_in), dtype=np.float32)
    if n_in == 1 or n_out == 1:
        m[:, 0] = 1.0
        return m
    scale = (n_in - 1) / (n_out - 1)
    for i in range(n_out):
        s = i * scale
        lo = min(int(np.floor(s)), n_in - 1)
        hi = min(lo + 1, n_in - 1)
        f = s - lo
        m[i, lo] += 1.0 - f
        m[i, hi] += f
    return m


def _pick_images_per_step(n, cin, cg, max_images=8):
    """Images packed per grid step.

    Prefer two grid steps (keeps both v7x TensorCores busy) when the packed
    block stays sublane-aligned; otherwise pack the whole (small) batch into
    one step so single-TC v5e/v6e pay the per-step pipeline overhead once and
    the packed block fills >= 8 sublanes even for small Cin."""
    cc = cin + cg

    def ok(b):
        return (n % b == 0 and
                (b == n or ((b * cc) % 8 == 0 and (b * cin) % 8 == 0)))

    if n % 2 == 0 and (n // 2) <= max_images and ok(n // 2):
        return n // 2
    for b in range(min(n, max_images), 0, -1):
        if ok(b):
            return b
    return 1


def _const_spec(shape):
    """BlockSpec for a constant block (index map never changes).  Uses a
    single buffer when the installed JAX supports `pipeline_mode`."""
    idx = lambda i, _nd=len(shape): (0,) * _nd
    try:
        return pl.BlockSpec(shape, idx, pipeline_mode=pl.Buffered(1))
    except (TypeError, AttributeError):
        return pl.BlockSpec(shape, idx)


# -----------------------------------------------------------------------------
# Wrapper
# -----------------------------------------------------------------------------
def attention_block(x_nchw, gating_nchw, params):
    n, cin, height, width = x_nchw.shape
    ng, cg, hh, ww = gating_nchw.shape
    assert n == ng and height % 2 == 0 and width % 2 == 0
    assert (hh, ww) == (height // 2, width // 2), \
        "gating must be half the spatial size of x"
    hw = hh * ww
    cc = cin + cg

    b_imgs = _pick_images_per_step(n, cin, cg)
    num_steps = n // b_imgs

    # Free reshape only: NCHW -> (N*Cin, H, W).
    x3 = x_nchw.reshape(n * cin, height, width).astype(jnp.float32)

    # Stride-2 1x1-conv subsample as a cheap XLA strided slice (replaces the
    # dense selection-matrix matmul), concatenated with the gating tensor so
    # theta_x and phi_g become ONE fused matmul inside the kernel.
    x_sub = x_nchw[:, :, ::2, ::2].reshape(n, cin, hw)
    z = jnp.concatenate([x_sub, gating_nchw.reshape(n, cg, hw)], axis=1)
    z = z.reshape(n * cc, hw).astype(jnp.float32)

    # Packed weight slab: [ wt | wp | wpsi | bt+bp | bpsi ] -> (Cin, CC+3).
    wslab = jnp.concatenate(
        [params["wt"], params["wp"], params["wpsi"],
         params["bt"] + params["bp"],
         jnp.broadcast_to(params["bpsi"], (cin, 1))],
        axis=1).astype(jnp.float32)

    # Kronecker factors of the align_corners=True bilinear 2x upsample.
    uh = jnp.asarray(_interp_matrix_align_corners(height, hh))      # (H, h)
    uwt = jnp.asarray(_interp_matrix_align_corners(width, ww).T)    # (w, W)

    kernel = _make_kernel(b_imgs, cin, cg, height, width)

    flops = n * (2 * cin * cc * hw + 3 * cin * hw
                 + 2 * height * ww * hh + 2 * height * width * ww
                 + cin * height * width)
    bytes_accessed = 4 * (2 * n * cin * height * width + n * cc * hw
                          + wslab.size + uh.size + uwt.size)
    cost = pl.CostEstimate(flops=int(flops), transcendentals=int(n * hw),
                           bytes_accessed=int(bytes_accessed))

    y = pl.pallas_call(
        kernel,
        out_shape=jax.ShapeDtypeStruct((n * cin, height, width), jnp.float32),
        grid=(num_steps,),
        in_specs=[
            pl.BlockSpec((b_imgs * cc, hw), lambda i: (i, 0)),
            pl.BlockSpec((b_imgs * cin, height, width), lambda i: (i, 0, 0)),
            _const_spec((cin, cc + 3)),
            _const_spec((height, hh)),
            _const_spec((ww, width)),
        ],
        out_specs=pl.BlockSpec((b_imgs * cin, height, width),
                               lambda i: (i, 0, 0)),
        compiler_params=pltpu.CompilerParams(
            dimension_semantics=("parallel",)),   # image blocks are independent
        cost_estimate=cost,
    )(z, x3, wslab, uh, uwt)
    return y.reshape(n, cin, height, width)


# -----------------------------------------------------------------------------
# Pure-JAX reference (independent implementation) for correctness checking
# -----------------------------------------------------------------------------
def _ref_upsample2x_align_corners(v):
    # v: (N, 1, h, w) -> (N, 1, 2h, 2w), bilinear, align_corners=True
    n, c, h, w = v.shape
    H, W = 2 * h, 2 * w
    yi = jnp.arange(H, dtype=jnp.float32) * ((h - 1) / (H - 1))
    xi = jnp.arange(W, dtype=jnp.float32) * ((w - 1) / (W - 1))
    y0 = jnp.floor(yi).astype(jnp.int32)
    x0 = jnp.floor(xi).astype(jnp.int32)
    y1 = jnp.minimum(y0 + 1, h - 1)
    x1 = jnp.minimum(x0 + 1, w - 1)
    fy = (yi - y0.astype(jnp.float32))[None, None, :, None]
    fx = (xi - x0.astype(jnp.float32))[None, None, None, :]
    v00 = v[:, :, y0][:, :, :, x0]
    v01 = v[:, :, y0][:, :, :, x1]
    v10 = v[:, :, y1][:, :, :, x0]
    v11 = v[:, :, y1][:, :, :, x1]
    return (v00 * (1 - fy) * (1 - fx) + v01 * (1 - fy) * fx
            + v10 * fy * (1 - fx) + v11 * fy * fx)


def ref_forward(x, g, p):
    hp = jax.lax.Precision.HIGHEST
    xs = x[:, :, ::2, ::2]                                           # stride-2 1x1 conv
    theta = jnp.einsum("oc,nchw->nohw", p["wt"], xs, precision=hp) \
        + p["bt"].reshape(1, -1, 1, 1)
    phi = jnp.einsum("oc,nchw->nohw", p["wp"], g, precision=hp) \
        + p["bp"].reshape(1, -1, 1, 1)
    add = jax.nn.relu(theta + phi)
    psi = jnp.einsum("c,nchw->nhw", p["wpsi"][:, 0], add, precision=hp)[:, None] \
        + p["bpsi"][0, 0]
    sig = jax.nn.sigmoid(psi)
    gate = _ref_upsample2x_align_corners(sig)
    return gate * x


# -----------------------------------------------------------------------------
def make_params(key, cin, cg):
    ks = jax.random.split(key, 6)
    rnd = lambda k, shp, s=0.2: (s * jax.random.normal(k, shp)).astype(jnp.float32)
    return {
        # PyTorch conv weights (Cout, Cin, 1, 1) stored squeezed to 2-D.
        "wt": rnd(ks[0], (cin, cin)),     # theta_x
        "bt": rnd(ks[1], (cin, 1)),
        "wp": rnd(ks[2], (cin, cg)),      # phi_g
        "bp": rnd(ks[3], (cin, 1)),
        "wpsi": rnd(ks[4], (cin, 1)),     # psi (1, Cin) stored as a column
        "bpsi": rnd(ks[5], (1, 1)),
    }


if __name__ == "__main__":
    N, Cin, Cg, H, W = 2, 4, 8, 16, 16
    key = jax.random.PRNGKey(0)
    kx, kg, kp = jax.random.split(key, 3)
    x = jax.random.normal(kx, (N, Cin, H, W), dtype=jnp.float32)
    gating = jax.random.normal(kg, (N, Cg, H // 2, W // 2), dtype=jnp.float32)
    params = make_params(kp, Cin, Cg)

    out = jax.block_until_ready(jax.jit(attention_block)(x, gating, params))

    ref = jax.block_until_ready(ref_forward(x, gating, params))
    assert out.shape == (N, Cin, H, W)
    max_err = float(jnp.max(jnp.abs(out - ref)))
    assert jnp.allclose(out, ref, atol=2e-3, rtol=2e-3), max_err

    print("KERNEL_OK")
</pallas_src>

<mosaic_0001>
module attributes {stable_mosaic.version = 11 : i64} {
  func.func @kernel(%arg0: i32, %arg1: memref<24x64xf32, #tpu.memory_space<vmem>>, %arg2: memref<8x16x16xf32, #tpu.memory_space<vmem>>, %arg3: memref<4x15xf32, #tpu.memory_space<vmem>>, %arg4: memref<16x8xf32, #tpu.memory_space<vmem>>, %arg5: memref<8x16xf32, #tpu.memory_space<vmem>>, %arg6: memref<8x16x16xf32, #tpu.memory_space<vmem>>) attributes {dimension_semantics = [#tpu.dimension_semantics<parallel>], iteration_bounds = array<i64: 1>, scalar_prefetch = 0 : i64, scratch_operands = 0 : i64, tpu.core_type = #tpu.core_type<tc>, window_params = [{transform_indices = @transform_0, window_bounds = array<i64: 24, 64>}, {transform_indices = @transform_1, window_bounds = array<i64: 8, 16, 16>}, {pipeline_mode = #tpu.pipeline_mode<synchronous>, transform_indices = @transform_2, window_bounds = array<i64: 4, 15>}, {pipeline_mode = #tpu.pipeline_mode<synchronous>, transform_indices = @transform_3, window_bounds = array<i64: 16, 8>}, {pipeline_mode = #tpu.pipeline_mode<synchronous>, transform_indices = @transform_4, window_bounds = array<i64: 8, 16>}, {transform_indices = @transform_5, window_bounds = array<i64: 8, 16, 16>}]} {
    %c0 = arith.constant 0 : index
    %c0_0 = arith.constant 0 : index
    %0 = vector.load %arg3[%c0, %c0_0] : memref<4x15xf32, #tpu.memory_space<vmem>>, vector<4x15xf32>
    %1 = vector.extract_strided_slice %0 {offsets = [0, 0], sizes = [4, 12], strides = [1, 1]} : vector<4x15xf32> to vector<4x12xf32>
    %2 = vector.extract_strided_slice %0 {offsets = [0, 12], sizes = [4, 1], strides = [1, 1]} : vector<4x15xf32> to vector<4x1xf32>
    %3 = vector.extract_strided_slice %0 {offsets = [0, 13], sizes = [4, 1], strides = [1, 1]} : vector<4x15xf32> to vector<4x1xf32>
    %4 = vector.extract_strided_slice %0 {offsets = [0, 14], sizes = [1, 1], strides = [1, 1]} : vector<4x15xf32> to vector<1x1xf32>
    %c0_1 = arith.constant 0 : index
    %c0_2 = arith.constant 0 : index
    %5 = vector.load %arg4[%c0_1, %c0_2] : memref<16x8xf32, #tpu.memory_space<vmem>>, vector<16x8xf32>
    %c0_3 = arith.constant 0 : index
    %c0_4 = arith.constant 0 : index
    %6 = vector.load %arg5[%c0_3, %c0_4] : memref<8x16xf32, #tpu.memory_space<vmem>>, vector<8x16xf32>
    %c0_5 = arith.constant 0 : index
    %c0_6 = arith.constant 0 : index
    %7 = vector.load %arg1[%c0_5, %c0_6] : memref<24x64xf32, #tpu.memory_space<vmem>>, vector<12x64xf32>
    %cst = arith.constant dense<0.000000e+00> : vector<4x64xf32>
    %8 = tpu.matmul %1, %7, %cst {dimension_numbers = #tpu.dot_dimension_numbers<[1], [0], [0], [1], [0, 0, 1, 1], [], []>} : vector<4x12xf32>, vector<12x64xf32>, vector<4x64xf32> -> vector<4x64xf32>
    %9 = vector.broadcast %3 : vector<4x1xf32> to vector<4x64xf32>
    %10 = arith.addf %8, %9 : vector<4x64xf32>
    %cst_7 = arith.constant 0.000000e+00 : f32
    %11 = vector.broadcast %cst_7 : f32 to vector<4x64xf32>
    %12 = arith.maximumf %10, %11 : vector<4x64xf32>
    %13 = vector.broadcast %2 : vector<4x1xf32> to vector<4x64xf32>
    %14 = arith.mulf %12, %13 : vector<4x64xf32>
    %cst_8 = arith.constant dense<0.000000e+00> : vector<64xf32>
    %15 = vector.multi_reduction <add>, %14, %cst_8 [0] : vector<4x64xf32> to vector<64xf32>
    %16 = vector.shape_cast %15 : vector<64xf32> to vector<1x64xf32>
    %17 = vector.broadcast %4 : vector<1x1xf32> to vector<1x64xf32>
    %18 = arith.addf %16, %17 : vector<1x64xf32>
    %cst_9 = arith.constant 0.000000e+00 : f32
    %19 = vector.broadcast %cst_9 : f32 to vector<1x64xf32>
    %20 = arith.subf %19, %18 : vector<1x64xf32>
    %21 = math.exp %20 : vector<1x64xf32>
    %cst_10 = arith.constant 1.000000e+00 : f32
    %22 = vector.broadcast %cst_10 : f32 to vector<1x64xf32>
    %23 = arith.addf %22, %21 : vector<1x64xf32>
    %24 = tpu.reciprocal %23 {approx = true} : vector<1x64xf32> -> vector<1x64xf32>
    %25 = vector.extract_strided_slice %5 {offsets = [0, 0], sizes = [16, 1], strides = [1, 1]} : vector<16x8xf32> to vector<16x1xf32>
    %26 = vector.extract_strided_slice %24 {offsets = [0, 0], sizes = [1, 8], strides = [1, 1]} : vector<1x64xf32> to vector<1x8xf32>
    %27 = vector.broadcast %25 : vector<16x1xf32> to vector<16x8xf32>
    %28 = vector.broadcast %26 : vector<1x8xf32> to vector<16x8xf32>
    %29 = arith.mulf %27, %28 : vector<16x8xf32>
    %30 = vector.extract_strided_slice %5 {offsets = [0, 1], sizes = [16, 1], strides = [1, 1]} : vector<16x8xf32> to vector<16x1xf32>
    %31 = vector.extract_strided_slice %24 {offsets = [0, 8], sizes = [1, 8], strides = [1, 1]} : vector<1x64xf32> to vector<1x8xf32>
    %32 = vector.broadcast %30 : vector<16x1xf32> to vector<16x8xf32>
    %33 = vector.broadcast %31 : vector<1x8xf32> to vector<16x8xf32>
    %34 = arith.mulf %32, %33 : vector<16x8xf32>
    %35 = arith.addf %29, %34 : vector<16x8xf32>
    %36 = vector.extract_strided_slice %5 {offsets = [0, 2], sizes = [16, 1], strides = [1, 1]} : vector<16x8xf32> to vector<16x1xf32>
    %37 = vector.extract_strided_slice %24 {offsets = [0, 16], sizes = [1, 8], strides = [1, 1]} : vector<1x64xf32> to vector<1x8xf32>
    %38 = vector.broadcast %36 : vector<16x1xf32> to vector<16x8xf32>
    %39 = vector.broadcast %37 : vector<1x8xf32> to vector<16x8xf32>
    %40 = arith.mulf %38, %39 : vector<16x8xf32>
    %41 = arith.addf %35, %40 : vector<16x8xf32>
    %42 = vector.extract_strided_slice %5 {offsets = [0, 3], sizes = [16, 1], strides = [1, 1]} : vector<16x8xf32> to vector<16x1xf32>
    %43 = vector.extract_strided_slice %24 {offsets = [0, 24], sizes = [1, 8], strides = [1, 1]} : vector<1x64xf32> to vector<1x8xf32>
    %44 = vector.broadcast %42 : vector<16x1xf32> to vector<16x8xf32>
    %45 = vector.broadcast %43 : vector<1x8xf32> to vector<16x8xf32>
    %46 = arith.mulf %44, %45 : vector<16x8xf32>
    %47 = arith.addf %41, %46 : vector<16x8xf32>
    %48 = vector.extract_strided_slice %5 {offsets = [0, 4], sizes = [16, 1], strides = [1, 1]} : vector<16x8xf32> to vector<16x1xf32>
    %49 = vector.extract_strided_slice %24 {offsets = [0, 32], sizes = [1, 8], strides = [1, 1]} : vector<1x64xf32> to vector<1x8xf32>
    %50 = vector.broadcast %48 : vector<16x1xf32> to vector<16x8xf32>
    %51 = vector.broadcast %49 : vector<1x8xf32> to vector<16x8xf32>
    %52 = arith.mulf %50, %51 : vector<16x8xf32>
    %53 = arith.addf %47, %52 : vector<16x8xf32>
    %54 = vector.extract_strided_slice %5 {offsets = [0, 5], sizes = [16, 1], strides = [1, 1]} : vector<16x8xf32> to vector<16x1xf32>
    %55 = vector.extract_strided_slice %24 {offsets = [0, 40], sizes = [1, 8], strides = [1, 1]} : vector<1x64xf32> to vector<1x8xf32>
    %56 = vector.broadcast %54 : vector<16x1xf32> to vector<16x8xf32>
    %57 = vector.broadcast %55 : vector<1x8xf32> to vector<16x8xf32>
    %58 = arith.mulf %56, %57 : vector<16x8xf32>
    %59 = arith.addf %53, %58 : vector<16x8xf32>
    %60 = vector.extract_strided_slice %5 {offsets = [0, 6], sizes = [16, 1], strides = [1, 1]} : vector<16x8xf32> to vector<16x1xf32>
    %61 = vector.extract_strided_slice %24 {offsets = [0, 48], sizes = [1, 8], strides = [1, 1]} : vector<1x64xf32> to vector<1x8xf32>
    %62 = vector.broadcast %60 : vector<16x1xf32> to vector<16x8xf32>
    %63 = vector.broadcast %61 : vector<1x8xf32> to vector<16x8xf32>
    %64 = arith.mulf %62, %63 : vector<16x8xf32>
    %65 = arith.addf %59, %64 : vector<16x8xf32>
    %66 = vector.extract_strided_slice %5 {offsets = [0, 7], sizes = [16, 1], strides = [1, 1]} : vector<16x8xf32> to vector<16x1xf32>
    %67 = vector.extract_strided_slice %24 {offsets = [0, 56], sizes = [1, 8], strides = [1, 1]} : vector<1x64xf32> to vector<1x8xf32>
    %68 = vector.broadcast %66 : vector<16x1xf32> to vector<16x8xf32>
    %69 = vector.broadcast %67 : vector<1x8xf32> to vector<16x8xf32>
    %70 = arith.mulf %68, %69 : vector<16x8xf32>
    %71 = arith.addf %65, %70 : vector<16x8xf32>
    %cst_11 = arith.constant dense<0.000000e+00> : vector<16x16xf32>
    %72 = tpu.matmul %71, %6, %cst_11 {dimension_numbers = #tpu.dot_dimension_numbers<[1], [0], [0], [1], [0, 0, 1, 1], [], []>} : vector<16x8xf32>, vector<8x16xf32>, vector<16x16xf32> -> vector<16x16xf32>
    %c0_12 = arith.constant 0 : index
    %c0_13 = arith.constant 0 : index
    %c0_14 = arith.constant 0 : index
    %73 = vector.load %arg2[%c0_12, %c0_13, %c0_14] : memref<8x16x16xf32, #tpu.memory_space<vmem>>, vector<4x16x16xf32>
    %74 = vector.shape_cast %72 : vector<16x16xf32> to vector<1x16x16xf32>
    %75 = vector.broadcast %74 : vector<1x16x16xf32> to vector<4x16x16xf32>
    %76 = arith.mulf %73, %75 : vector<4x16x16xf32>
    %c0_15 = arith.constant 0 : index
    %c0_16 = arith.constant 0 : index
    %c0_17 = arith.constant 0 : index
    %77 = vector.load %arg6[%c0_15, %c0_16, %c0_17] : memref<8x16x16xf32, #tpu.memory_space<vmem>>, vector<4x16x16xf32>
    tpu.vector_store %arg6[%c0_15, %c0_16, %c0_17], %76 {strides = array<i32>} : memref<8x16x16xf32, #tpu.memory_space<vmem>>, vector<4x16x16xf32>,
    %c12 = arith.constant 12 : index
    %c0_18 = arith.constant 0 : index
    %78 = vector.load %arg1[%c12, %c0_18] : memref<24x64xf32, #tpu.memory_space<vmem>>, vector<12x64xf32>
    %cst_19 = arith.constant dense<0.000000e+00> : vector<4x64xf32>
    %79 = tpu.matmul %1, %78, %cst_19 {dimension_numbers = #tpu.dot_dimension_numbers<[1], [0], [0], [1], [0, 0, 1, 1], [], []>} : vector<4x12xf32>, vector<12x64xf32>, vector<4x64xf32> -> vector<4x64xf32>
    %80 = vector.broadcast %3 : vector<4x1xf32> to vector<4x64xf32>
    %81 = arith.addf %79, %80 : vector<4x64xf32>
    %cst_20 = arith.constant 0.000000e+00 : f32
    %82 = vector.broadcast %cst_20 : f32 to vector<4x64xf32>
    %83 = arith.maximumf %81, %82 : vector<4x64xf32>
    %84 = vector.broadcast %2 : vector<4x1xf32> to vector<4x64xf32>
    %85 = arith.mulf %83, %84 : vector<4x64xf32>
    %cst_21 = arith.constant dense<0.000000e+00> : vector<64xf32>
    %86 = vector.multi_reduction <add>, %85, %cst_21 [0] : vector<4x64xf32> to vector<64xf32>
    %87 = vector.shape_cast %86 : vector<64xf32> to vector<1x64xf32>
    %88 = vector.broadcast %4 : vector<1x1xf32> to vector<1x64xf32>
    %89 = arith.addf %87, %88 : vector<1x64xf32>
    %cst_22 = arith.constant 0.000000e+00 : f32
    %90 = vector.broadcast %cst_22 : f32 to vector<1x64xf32>
    %91 = arith.subf %90, %89 : vector<1x64xf32>
    %92 = math.exp %91 : vector<1x64xf32>
    %cst_23 = arith.constant 1.000000e+00 : f32
    %93 = vector.broadcast %cst_23 : f32 to vector<1x64xf32>
    %94 = arith.addf %93, %92 : vector<1x64xf32>
    %95 = tpu.reciprocal %94 {approx = true} : vector<1x64xf32> -> vector<1x64xf32>
    %96 = vector.extract_strided_slice %5 {offsets = [0, 0], sizes = [16, 1], strides = [1, 1]} : vector<16x8xf32> to vector<16x1xf32>
    %97 = vector.extract_strided_slice %95 {offsets = [0, 0], sizes = [1, 8], strides = [1, 1]} : vector<1x64xf32> to vector<1x8xf32>
    %98 = vector.broadcast %96 : vector<16x1xf32> to vector<16x8xf32>
    %99 = vector.broadcast %97 : vector<1x8xf32> to vector<16x8xf32>
    %100 = arith.mulf %98, %99 : vector<16x8xf32>
    %101 = vector.extract_strided_slice %5 {offsets = [0, 1], sizes = [16, 1], strides = [1, 1]} : vector<16x8xf32> to vector<16x1xf32>
    %102 = vector.extract_strided_slice %95 {offsets = [0, 8], sizes = [1, 8], strides = [1, 1]} : vector<1x64xf32> to vector<1x8xf32>
    %103 = vector.broadcast %101 : vector<16x1xf32> to vector<16x8xf32>
    %104 = vector.broadcast %102 : vector<1x8xf32> to vector<16x8xf32>
    %105 = arith.mulf %103, %104 : vector<16x8xf32>
    %106 = arith.addf %100, %105 : vector<16x8xf32>
    %107 = vector.extract_strided_slice %5 {offsets = [0, 2], sizes = [16, 1], strides = [1, 1]} : vector<16x8xf32> to vector<16x1xf32>
    %108 = vector.extract_strided_slice %95 {offsets = [0, 16], sizes = [1, 8], strides = [1, 1]} : vector<1x64xf32> to vector<1x8xf32>
    %109 = vector.broadcast %107 : vector<16x1xf32> to vector<16x8xf32>
    %110 = vector.broadcast %108 : vector<1x8xf32> to vector<16x8xf32>
    %111 = arith.mulf %109, %110 : vector<16x8xf32>
    %112 = arith.addf %106, %111 : vector<16x8xf32>
    %113 = vector.extract_strided_slice %5 {offsets = [0, 3], sizes = [16, 1], strides = [1, 1]} : vector<16x8xf32> to vector<16x1xf32>
    %114 = vector.extract_strided_slice %95 {offsets = [0, 24], sizes = [1, 8], strides = [1, 1]} : vector<1x64xf32> to vector<1x8xf32>
    %115 = vector.broadcast %113 : vector<16x1xf32> to vector<16x8xf32>
    %116 = vector.broadcast %114 : vector<1x8xf32> to vector<16x8xf32>
    %117 = arith.mulf %115, %116 : vector<16x8xf32>
    %118 = arith.addf %112, %117 : vector<16x8xf32>
    %119 = vector.extract_strided_slice %5 {offsets = [0, 4], sizes = [16, 1], strides = [1, 1]} : vector<16x8xf32> to vector<16x1xf32>
    %120 = vector.extract_strided_slice %95 {offsets = [0, 32], sizes = [1, 8], strides = [1, 1]} : vector<1x64xf32> to vector<1x8xf32>
    %121 = vector.broadcast %119 : vector<16x1xf32> to vector<16x8xf32>
    %122 = vector.broadcast %120 : vector<1x8xf32> to vector<16x8xf32>
    %123 = arith.mulf %121, %122 : vector<16x8xf32>
    %124 = arith.addf %118, %123 : vector<16x8xf32>
    %125 = vector.extract_strided_slice %5 {offsets = [0, 5], sizes = [16, 1], strides = [1, 1]} : vector<16x8xf32> to vector<16x1xf32>
    %126 = vector.extract_strided_slice %95 {offsets = [0, 40], sizes = [1, 8], strides = [1, 1]} : vector<1x64xf32> to vector<1x8xf32>
    %127 = vector.broadcast %125 : vector<16x1xf32> to vector<16x8xf32>
    %128 = vector.broadcast %126 : vector<1x8xf32> to vector<16x8xf32>
    %129 = arith.mulf %127, %128 : vector<16x8xf32>
    %130 = arith.addf %124, %129 : vector<16x8xf32>
    %131 = vector.extract_strided_slice %5 {offsets = [0, 6], sizes = [16, 1], strides = [1, 1]} : vector<16x8xf32> to vector<16x1xf32>
    %132 = vector.extract_strided_slice %95 {offsets = [0, 48], sizes = [1, 8], strides = [1, 1]} : vector<1x64xf32> to vector<1x8xf32>
    %133 = vector.broadcast %131 : vector<16x1xf32> to vector<16x8xf32>
    %134 = vector.broadcast %132 : vector<1x8xf32> to vector<16x8xf32>
    %135 = arith.mulf %133, %134 : vector<16x8xf32>
    %136 = arith.addf %130, %135 : vector<16x8xf32>
    %137 = vector.extract_strided_slice %5 {offsets = [0, 7], sizes = [16, 1], strides = [1, 1]} : vector<16x8xf32> to vector<16x1xf32>
    %138 = vector.extract_strided_slice %95 {offsets = [0, 56], sizes = [1, 8], strides = [1, 1]} : vector<1x64xf32> to vector<1x8xf32>
    %139 = vector.broadcast %137 : vector<16x1xf32> to vector<16x8xf32>
    %140 = vector.broadcast %138 : vector<1x8xf32> to vector<16x8xf32>
    %141 = arith.mulf %139, %140 : vector<16x8xf32>
    %142 = arith.addf %136, %141 : vector<16x8xf32>
    %cst_24 = arith.constant dense<0.000000e+00> : vector<16x16xf32>
    %143 = tpu.matmul %142, %6, %cst_24 {dimension_numbers = #tpu.dot_dimension_numbers<[1], [0], [0], [1], [0, 0, 1, 1], [], []>} : vector<16x8xf32>, vector<8x16xf32>, vector<16x16xf32> -> vector<16x16xf32>
    %c4 = arith.constant 4 : index
    %c0_25 = arith.constant 0 : index
    %c0_26 = arith.constant 0 : index
    %144 = vector.load %arg2[%c4, %c0_25, %c0_26] : memref<8x16x16xf32, #tpu.memory_space<vmem>>, vector<4x16x16xf32>
    %145 = vector.shape_cast %143 : vector<16x16xf32> to vector<1x16x16xf32>
    %146 = vector.broadcast %145 : vector<1x16x16xf32> to vector<4x16x16xf32>
    %147 = arith.mulf %144, %146 : vector<4x16x16xf32>
    %c4_27 = arith.constant 4 : index
    %c0_28 = arith.constant 0 : index
    %c0_29 = arith.constant 0 : index
    %148 = vector.load %arg6[%c4_27, %c0_28, %c0_29] : memref<8x16x16xf32, #tpu.memory_space<vmem>>, vector<4x16x16xf32>
    tpu.vector_store %arg6[%c4_27, %c0_28, %c0_29], %147 {strides = array<i32>} : memref<8x16x16xf32, #tpu.memory_space<vmem>>, vector<4x16x16xf32>,
    return
  }
  func.func @transform_0(%arg0: i32) -> (i32, i32) {
    %c0_i32 = arith.constant 0 : i32
    %c0_i32_0 = arith.constant 0 : i32
    return %arg0, %c0_i32 : i32, i32
  }
  func.func @transform_1(%arg0: i32) -> (i32, i32, i32) {
    %c0_i32 = arith.constant 0 : i32
    %c0_i32_0 = arith.constant 0 : i32
    %c0_i32_1 = arith.constant 0 : i32
    return %arg0, %c0_i32, %c0_i32_0 : i32, i32, i32
  }
  func.func @transform_2(%arg0: i32) -> (i32, i32) {
    %c0_i32 = arith.constant 0 : i32
    %c0_i32_0 = arith.constant 0 : i32
    %c0_i32_1 = arith.constant 0 : i32
    return %c0_i32, %c0_i32_0 : i32, i32
  }
  func.func @transform_3(%arg0: i32) -> (i32, i32) {
    %c0_i32 = arith.constant 0 : i32
    %c0_i32_0 = arith.constant 0 : i32
    %c0_i32_1 = arith.constant 0 : i32
    return %c0_i32, %c0_i32_0 : i32, i32
  }
  func.func @transform_4(%arg0: i32) -> (i32, i32) {
    %c0_i32 = arith.constant 0 : i32
    %c0_i32_0 = arith.constant 0 : i32
    %c0_i32_1 = arith.constant 0 : i32
    return %c0_i32, %c0_i32_0 : i32, i32
  }
  func.func @transform_5(%arg0: i32) -> (i32, i32, i32) {
    %c0_i32 = arith.constant 0 : i32
    %c0_i32_0 = arith.constant 0 : i32
    %c0_i32_1 = arith.constant 0 : i32
    return %arg0, %c0_i32, %c0_i32_0 : i32, i32, i32
  }
}

</mosaic_0001>

<bundles_post_ra>
// kernel: attention_block.1
= control target key start
LH: loop header
LB: loop body
LE: loop exit
PB: predicated region body
PF: predicated region fallthrough
CT: control target
= control target key end

     0   :  { %vm35_vm0 = vcmask 1043456   ;;  %v821_v1 = vmov 0.0   ;;  %vm822_vm1 = vmmov 0   ;;  %vm32_vm2 = vcmask 97280   ;;  %s1101_s0 = inlined_call_operand.vmem [shape: f32[24,64], index: 0, kind: input, shape index: {}]   ;;  %s1102_s1 = inlined_call_operand.vmem [shape: f32[8,16,16], index: 1, kind: input, shape index: {}]   ;;  %s1103_s2 = inlined_call_operand.vmem [shape: f32[4,15], index: 2, kind: input, shape index: {}]   ;;  %s1104_s3 = inlined_call_operand.vmem [shape: f32[16,8], index: 3, kind: input, shape index: {}]   ;;  %s1105_s4 = inlined_call_operand.vmem [shape: f32[8,16], index: 4, kind: input, shape index: {}]   ;;  %s1106_s5 = inlined_call_operand.hbm [shape: f32[8,16,16], index: 5, kind: output, shape index: {}]  }
   0x1   :  { %v26_v0 = vld [vmem:[%s1101_s0 + $0x8] sm:$0xf]  ;;  %727 = vmatprep.subr.mxu0 %v821_v1  ;;  %v25_v2 = vld [vmem:[%s1101_s0] sm:$0xff]  ;;  %731 = vmatprep.mubr.msk.f32.mxu0 %vm822_vm1, %v821_v1  ;;  %v823_v4 = vmov 13  }
   0x2   :  { %728 = vmatpush3.msk.msra.mxu0 %vm35_vm0, %v26_v0  ;;  %v887_v3 = vld [vmem:[%s1103_s2] sm:$0xf]  ;;  %774 = vset.pattern.permute.xlu0 %v823_v4 }
   0x3   :  { %729 = vmatprep.subr.mxu0 %v821_v1  ;;  %29 = vperm.xlu0 %774, %v887_v3  }
   0x4   :  { %10 = vsyncpa [#allocation3], 0  ;;  %730 = vmatpush3.msra.mxu0 %v25_v2  ;;  %v824_v5 = vmov 14   ;;  %v825_v6 = vmov 12   ;;  %v22_v7 = vld [vmem:[%s1104_s3] sm:$0xff]  ;;  %v826_v8 = vmov 1   ;;  %v143_v40 = vlaneseq }
   0x5   :  { %776 = vset.pattern.permute.xlu1 %v824_v5  ;;  %732 = vmatmul.mubr.msk.f32.vlgmr.msra.gmra.mxu0 %vm32_vm2, %v887_v3  ;;  %v23_v9 = vld [vmem:[%s1104_s3 + $0x8] sm:$0xff]  ;;  %v827_v10 = vmov 2   ;;  %v828_v11 = vmov 3   ;;  %v829_v12 = vmov 5   ;;  %v830_v13 = vmov 6   ;;  %s834_s3 = smov 120  }
   0x6   :  { %124 = vperm.xlu1 %776, %v887_v3   ;;  %v831_v14 = vmov 4   ;;  %v832_v15 = vmov 0   ;;  %v833_v16 = vmov 7   ;;  %vm115_vm3 = vcmask 519168   ;;  %s835_s27 = smov 112   ;;  %s836_s28 = smov 104  }
   0x7   :  { %775 = vset.pattern.permute.xlu0 %v825_v6  ;;  %v919_v42 = vshrl.u32 %v143_v40, 7  ;;  %s837_s29 = smov 96   ;;  %v24_v61 = vld [vmem:[%s1105_s4] sm:$0xff]  ;;  %s838_s7 = smov 88   ;;  %vm289_vm4 = vcmask 64512   ;;  %vm387_vm5 = vcmask 130048  }
   0x8   :  { %111 = vperm.xlu0 %775, %v887_v3   ;;  %734 = vmatprep.subr.mxu1 %v24_v61  ;;  %s839_s4 = smov 80   ;;  %s840_s8 = smov 72  }
   0x9   :  { %v145_v44 = vsub.s32 0, %v919_v42  ;;  %735 = vmatpush3.msra.mxu1 %v24_v61  ;;  %746 = vmatprep.subr.mxu0 %v24_v61  ;;  %s841_s16 = smov [#allocation2]  }
   0xa   :  { %777 = vset.pattern.permute.xlu1 %v826_v8  ;;  %739 = vmatprep.subr.mxu1 %v821_v1 }
   0xb   :  { %150 = vperm.xlu1 %777, %v22_v7   ;;  %747 = vmatpush3.msra.mxu0 %v24_v61  ;;  %v376_v61 = vld [vmem:[%s1102_s1 + $0x28] sm:$0xff] }
   0xc   :  { %778 = vset.pattern.permute.xlu0 %v827_v10 }
   0xd   :  { %170 = vperm.xlu0 %778, %v22_v7  }
   0xf   :  { %154 = vperm.xlu1 %777, %v23_v9  }
  0x11   :  { %781 = vset.pattern.permute.xlu0 %v828_v11 }
  0x12   :  { %194 = vperm.xlu0 %781, %v23_v9  }
  0x13   :  { %779 = vset.pattern.permute.xlu1 %v827_v10 }
  0x14   :  { %174 = vperm.xlu1 %779, %v23_v9  }
  0x16   :  { %783 = vset.pattern.permute.xlu0 %v829_v12 }
  0x17   :  { %230 = vperm.xlu0 %783, %v22_v7  }
  0x18   :  { %780 = vset.pattern.permute.xlu1 %v828_v11 }
  0x19   :  { %190 = vperm.xlu1 %780, %v22_v7  }
  0x1b   :  { %786 = vset.pattern.permute.xlu0 %v830_v13 }
  0x1c   :  { %254 = vperm.xlu0 %786, %v23_v9  }
  0x1d   :  { %782 = vset.pattern.permute.xlu1 %v831_v14 }
  0x1e   :  { %210 = vperm.xlu1 %782, %v22_v7  }
  0x20   :  { %788 = vset.pattern.permute.xlu0 %v832_v15 }
  0x21   :  { %135 = vperm.xlu0 %788, %v22_v7  }
  0x22   :  { %214 = vperm.xlu1 %782, %v23_v9  }
  0x25   :  { %790 = vset.pattern.permute.xlu0 %v833_v16 }
  0x26   :  { %784 = vset.pattern.permute.xlu1 %v829_v12 }
  0x27   :  { %234 = vperm.xlu1 %784, %v23_v9  }
  0x2b   :  { %785 = vset.pattern.permute.xlu1 %v830_v13 }
  0x2c   :  { %250 = vperm.xlu1 %785, %v22_v7  }
  0x30   :  { %787 = vset.pattern.permute.xlu1 %v833_v16 }
  0x31   :  { %270 = vperm.xlu1 %787, %v22_v7  }
  0x35   :  { %274 = vperm.xlu1 %787, %v23_v9  }
  0x39   :  { %789 = vset.pattern.permute.xlu1 %v832_v15 }
  0x3a   :  { %140 = vperm.xlu1 %789, %v23_v9  }
  0x7e   :  { %v901_v17 = vpop.permute.xlu0 %29 }
  0x81   :  { %v908_v31 = vpop.permute.xlu1 %124 }
  0x83   :  { %v904_v21 = vpop.permute.xlu0 %111 }
  0x86   :  { %v911_v35 = vpop.permute.xlu1 %150 }
  0x88   :  { %v930_v50 = vpop.permute.xlu0 %170 }
  0x8a   :  { %v913_v36 = vpop.permute.xlu1 %154 }
  0x8d   :  { %v939_v54 = vpop.permute.xlu0 %194 }
  0x8f   :  { %v915_v38 = vpop.permute.xlu1 %174 }
  0x92   :  { %v950_v60 = vpop.permute.xlu0 %230 }
  0x94   :  { %v917_v41 = vpop.permute.xlu1 %190 }
  0x97   :  { %v963_v2 = vpop.permute.xlu0 %254 }
  0x99   :  { %v921_v43 = vpop.permute.xlu1 %210 }
  0x9c   :  { %v976_v9 = vpop.permute.xlu0 %135 }
  0x9d   :  { %v926_v47 = vpop.permute.xlu1 %214 }
  0xa2   :  { %v935_v52 = vpop.permute.xlu1 %234 }
  0xa7   :  { %v945_v57 = vpop.permute.xlu1 %250 }
  0xac   :  { %v958_v63 = vpop.permute.xlu1 %270 }
  0xb0   :  { %v969_v6 = vpop.permute.xlu1 %274 }
  0xb5   :  { %v978_v10 = vpop.permute.xlu1 %140 }
  0xc5   :  { %v105_v18 = vpop.f32.mrf.mxu0 }
  0xc6   :  { %v106_v19 = vadd.f32 %v105_v18, %v901_v17 }
  0xc7   :  { %v733_v20 = vpop.f32.mrf.mxu0 }
  0xc8   :  { %v109_v22 = vmax.f32 %v106_v19, 0.0 }
  0xca   :  { %v114_v23 = vmul.f32 %v904_v21, %v109_v22 }
  0xcc   :  { %v116_v24 = vsel %vm115_vm3, %v114_v23, 0.0 }
  0xcd   :  { %v117_v25 = vrot.slane %v116_v24, 4 }
  0xcf   :  { %v118_v26 = vadd.f32 %v117_v25, %v116_v24 }
  0xd1   :  { %v119_v27 = vrot.slane %v118_v26, 2 }
  0xd3   :  { %v120_v28 = vadd.f32 %v119_v27, %v118_v26 }
  0xd5   :  { %v121_v29 = vrot.slane %v120_v28, 1 }
  0xd7   :  { %v122_v30 = vadd.f32 %v121_v29, %v120_v28 }
  0xd9   :  { %v127_v32 = vadd.f32 %v908_v31, %v122_v30 }
  0xdb   :  { %v128_v33 = vsub.f32 0.0, %v127_v32 }
  0xdd   :  { %v129_v34 = vmul.f32 1.442695, %v128_v33 }
  0xdf   :  { %791 = vpow2.f32 %v129_v34 }
  0xec   :  { %v792_v37 = vpop.eup %791 }
  0xed   :  { %v131_v39 = vadd.f32 1.0, %v792_v37 }
  0xef   :  { %793 = vrcp.f32 %v131_v39 }
  0xfc   :  { %v794_v45 = vpop.eup %793 }
  0xfd   :  { %v146_v46 = vrot.slane %v794_v45, %v145_v44 }
  0xff   :  { %v157_v48 = vmul.f32 %v911_v35, %v146_v46  ;;  %v158_v49 = vmul.f32 %v913_v36, %v146_v46  ;;  %v178_v51 = vmul.f32 %v915_v38, %v146_v46  ;;  %v177_v53 = vmul.f32 %v930_v50, %v146_v46 }
 0x100   :  { %v198_v55 = vmul.f32 %v939_v54, %v146_v46  ;;  %v197_v56 = vmul.f32 %v917_v41, %v146_v46  ;;  %v218_v58 = vmul.f32 %v926_v47, %v146_v46  ;;  %v217_v59 = vmul.f32 %v921_v43, %v146_v46 }
 0x101   :  { %163 = vrot.lane.b32.xlu0 %v158_v49, %s834_s3  ;;  %161 = vrot.lane.b32.xlu1 %v157_v48, %s834_s3  ;;  %v238_v62 = vmul.f32 %v935_v52, %v146_v46  ;;  %v237_v0 = vmul.f32 %v950_v60, %v146_v46  ;;  %v258_v4 = vmul.f32 %v963_v2, %v146_v46 }
 0x102   :  { %v257_v5 = vmul.f32 %v945_v57, %v146_v46  ;;  %v278_v7 = vmul.f32 %v969_v6, %v146_v46  ;;  %v277_v8 = vmul.f32 %v958_v63, %v146_v46  ;;  %v148_v18 = vmul.f32 %v146_v46, %v978_v10 }
 0x103   :  { %v147_v19 = vmul.f32 %v146_v46, %v976_v9 }
 0x105   :  { %183 = vrot.lane.b32.xlu0 %v178_v51, %s835_s27  ;;  %181 = vrot.lane.b32.xlu1 %v177_v53, %s835_s27 }
 0x109   :  { %203 = vrot.lane.b32.xlu0 %v198_v55, %s836_s28  ;;  %201 = vrot.lane.b32.xlu1 %v197_v56, %s836_s28  ;;  %v397_v55 = vld [vmem:[%s1101_s0 + $0x14] sm:$0xf]  ;;  %v396_v56 = vld [vmem:[%s1101_s0 + $0xc] sm:$0xff]  ;;  %s688_s0 = sshll.u32 %s841_s16, 4  ;;  %s689_s0 = int_to_ptr.vmem [resolvable:$true] %s688_s0 }
 0x10a   :  { %p804_p1 = scmp.lt.s32.totalorder %s689_s0, %s689_s0 }
 0x10d   :  { %223 = vrot.lane.b32.xlu0 %v218_v58, %s837_s29  ;;  %221 = vrot.lane.b32.xlu1 %v217_v59, %s837_s29  ;;  %v372_v58 = vld [vmem:[%s1102_s1 + $0x8] sm:$0xff]  ;;  %v374_v59 = vld [vmem:[%s1102_s1 + $0x18] sm:$0xff] }
 0x111   :  { %243 = vrot.lane.b32.xlu0 %v238_v62, %s838_s7  ;;  %241 = vrot.lane.b32.xlu1 %v237_v0, %s838_s7  ;;  %v373_v0 = vld [vmem:[%s1102_s1 + $0x10] sm:$0xff] }
 0x115   :  { %263 = vrot.lane.b32.xlu0 %v258_v4, %s839_s4  ;;  %261 = vrot.lane.b32.xlu1 %v257_v5, %s839_s4  ;;  %v375_v4 = vld [vmem:[%s1102_s1 + $0x20] sm:$0xff]  ;;  %v377_v5 = vld [vmem:[%s1102_s1 + $0x30] sm:$0xff] }
 0x119   :  { %283 = vrot.lane.b32.xlu0 %v278_v7, %s840_s8  ;;  %281 = vrot.lane.b32.xlu1 %v277_v8, %s840_s8 }
 0x173   :  { %v164_v11 = vpop.permute.xlu0 %163  ;;  %v162_v12 = vpop.permute.xlu1 %161 }
 0x174   :  { %v168_v22 = vadd.f32 %v164_v11, %v148_v18  ;;  %v167_v24 = vadd.f32 %v162_v12, %v147_v19 }
 0x177   :  { %v184_v13 = vpop.permute.xlu0 %183  ;;  %v182_v14 = vpop.permute.xlu1 %181 }
 0x178   :  { %v188_v25 = vadd.f32 %v184_v13, %v168_v22  ;;  %v187_v26 = vadd.f32 %v182_v14, %v167_v24 }
 0x17b   :  { %v204_v15 = vpop.permute.xlu0 %203  ;;  %v202_v16 = vpop.permute.xlu1 %201 }
 0x17c   :  { %v208_v28 = vadd.f32 %v204_v15, %v188_v25  ;;  %v207_v30 = vadd.f32 %v202_v16, %v187_v26 }
 0x17f   :  { %v224_v20 = vpop.permute.xlu0 %223  ;;  %v222_v23 = vpop.permute.xlu1 %221 }
 0x180   :  { %v228_v32 = vadd.f32 %v224_v20, %v208_v28  ;;  %v227_v33 = vadd.f32 %v222_v23, %v207_v30 }
 0x183   :  { %v244_v27 = vpop.permute.xlu0 %243  ;;  %v242_v29 = vpop.permute.xlu1 %241 }
 0x184   :  { %v248_v37 = vadd.f32 %v244_v27, %v228_v32  ;;  %v247_v40 = vadd.f32 %v242_v29, %v227_v33 }
 0x187   :  { %v264_v34 = vpop.permute.xlu0 %263  ;;  %v262_v39 = vpop.permute.xlu1 %261 }
 0x188   :  { %v268_v45 = vadd.f32 %v264_v34, %v248_v37  ;;  %v267_v48 = vadd.f32 %v262_v39, %v247_v40 }
 0x18b   :  { %v284_v49 = vpop.permute.xlu0 %283  ;;  %v282_v51 = vpop.permute.xlu1 %281 }
 0x18c   :  { %v288_v46 = vadd.f32 %v284_v49, %v268_v45  ;;  %v287_v53 = vadd.f32 %v282_v51, %v267_v48 }
 0x18e   :  { %736 = vmatprep.mubr.msk.f32.mxu1 %vm289_vm4, %v287_v53 }
 0x18f   :  { %737 = vmatmul.mubr.msk.f32.vlgmr.msra.gmra.mxu1 %vm289_vm4, %v288_v46 }
 0x190   :  { %740 = vmatpush3.msk.msra.mxu1 %vm35_vm0, %v397_v55  ;;  %743 = vmatprep.mubr.msk.f32.mxu1 %vm822_vm1, %v821_v1 }
 0x191   :  { %741 = vmatprep.subr.mxu1 %v821_v1  ;;  %v378_v1 = vld [vmem:[%s1102_s1 + $0x38] sm:$0xff] }
 0x192   :  { %742 = vmatpush3.msra.mxu1 %v396_v56 }
 0x193   :  { %744 = vmatmul.mubr.msk.f32.vlgmr.msra.gmra.mxu1 %vm32_vm2, %v887_v3  ;;  %v371_v3 = vld [vmem:[%s1102_s1] sm:$0xff] }
 0x24f   :  { %v738_v62 = vpop.f32.mrf.mxu1 }
 0x250   :  { %v380_v7 = vmul.f32 %v738_v62, %v372_v58  ;;  %v382_v8 = vmul.f32 %v738_v62, %v374_v59  ;;  %v384_v11 = vmul.f32 %v738_v62, %v376_v61  ;;  %v386_v12 = vmul.f32 %v738_v62, %v378_v1 }
 0x251   :  { %v362_v13 = vpop.f32.mrf.mxu1 }
 0x252   :  { %389 = vst.msk [vmem:[#allocation2 + $0x8] sm:$0xff] %vm387_vm5, %v380_v7  ;;  %391 = vst.msk [vmem:[#allocation2 + $0x18] sm:$0xff] %vm387_vm5, %v382_v8  ;;  %v379_v14 = vmul.f32 %v371_v3, %v362_v13  ;;  %v381_v15 = vmul.f32 %v373_v0, %v362_v13  ;;  %v383_v16 = vmul.f32 %v375_v4, %v362_v13 }
 0x253   :  { %393 = vst.msk [vmem:[#allocation2 + $0x28] sm:$0xff] %vm387_vm5, %v384_v11  ;;  %395 = vst.msk [vmem:[#allocation2 + $0x38] sm:$0xff] %vm387_vm5, %v386_v12  ;;  %v385_v18 = vmul.f32 %v377_v5, %v362_v13  ;;  %v467_v19 = vpop.f32.mrf.mxu1 }
 0x254   :  { %388 = vst.msk [vmem:[#allocation2] sm:$0xff] %vm387_vm5, %v379_v14  ;;  %390 = vst.msk [vmem:[#allocation2 + $0x10] sm:$0xff] %vm387_vm5, %v381_v15  ;;  %v468_v20 = vadd.f32 %v467_v19, %v901_v17  ;;  %v710_v19 = vld [vmem:[%s1102_s1 + $0x58] sm:$0xff] }
 0x255   :  { %392 = vst.msk [vmem:[#allocation2 + $0x20] sm:$0xff] %vm387_vm5, %v383_v16  ;;  %394 = vst.msk [vmem:[#allocation2 + $0x30] sm:$0xff] %vm387_vm5, %v385_v18  ;;  %v745_v22 = vpop.f32.mrf.mxu1  ;;  %v708_v18 = vld [vmem:[%s1102_s1 + $0x48] sm:$0xff] }
 0x256   :  { %v471_v23 = vmax.f32 %v468_v20, 0.0  ;;  %v712_v20 = vld [vmem:[%s1102_s1 + $0x68] sm:$0xff]  ;;  %v714_v22 = vld [vmem:[%s1102_s1 + $0x78] sm:$0xff] }
 0x258   :  { %v472_v24 = vmul.f32 %v471_v23, %v904_v21  ;;  %v707_v23 = vld [vmem:[%s1102_s1 + $0x40] sm:$0xff] }
 0x25a   :  { %v473_v25 = vsel %vm115_vm3, %v472_v24, 0.0 }
 0x25b   :  { %v474_v26 = vrot.slane %v473_v25, 4 }
 0x25d   :  { %v475_v27 = vadd.f32 %v474_v26, %v473_v25  ;;  %v709_v25 = vld [vmem:[%s1102_s1 + $0x50] sm:$0xff]  ;;  %v711_v26 = vld [vmem:[%s1102_s1 + $0x60] sm:$0xff] }
 0x25f   :  { %v476_v28 = vrot.slane %v475_v27, 2 }
 0x261   :  { %v477_v29 = vadd.f32 %v476_v28, %v475_v27  ;;  %v713_v27 = vld [vmem:[%s1102_s1 + $0x70] sm:$0xff]  ;;  %s799_s1 = scalar_lea.vmem %s689_s0, 2048 }
 0x262   :  { %p800_p0 = scmp.ne.s32.totalorder %s689_s0, %s799_s1  ;;  %p805_p2 = scmp.lt.s32.totalorder %s799_s1, %s799_s1 }
 0x263   :  { %v478_v30 = vrot.slane %v477_v29, 1 }
 0x264   :  { %p806_p3 = por %p805_p2, %p804_p1 }
 0x265   :  { %v479_v32 = vadd.f32 %v478_v30, %v477_v29 }
 0x266   :  { %p807_p4 = pnand %p806_p3, %p800_p0 }
 0x267   :  { %v480_v33 = vadd.f32 %v479_v32, %v908_v31 }
 0x269   :  { %v481_v34 = vsub.f32 0.0, %v480_v33 }
 0x26b   :  { %v482_v37 = vmul.f32 1.442695, %v481_v34 }
 0x26d   :  { %795 = vpow2.f32 %v482_v37 }
 0x27a   :  { %v796_v39 = vpop.eup %795 }
 0x27b   :  { %v484_v40 = vadd.f32 1.0, %v796_v39 }
 0x27d   :  { %797 = vrcp.f32 %v484_v40 }
 0x28a   :  { %v798_v17 = vpop.eup %797 }
 0x28b   :  { %v489_v21 = vrot.slane %v798_v17, %v145_v44 }
 0x28d   :  { %v493_v45 = vmul.f32 %v489_v21, %v913_v36  ;;  %v492_v48 = vmul.f32 %v489_v21, %v911_v35  ;;  %v505_v31 = vmul.f32 %v489_v21, %v915_v38  ;;  %v504_v49 = vmul.f32 %v489_v21, %v930_v50 }
 0x28e   :  { %v517_v46 = vmul.f32 %v489_v21, %v939_v54  ;;  %v516_v42 = vmul.f32 %v489_v21, %v917_v41  ;;  %v529_v35 = vmul.f32 %v489_v21, %v926_v47  ;;  %v528_v36 = vmul.f32 %v489_v21, %v921_v43 }
 0x28f   :  { %498 = vrot.lane.b32.xlu0 %v493_v45, %s834_s3  ;;  %496 = vrot.lane.b32.xlu1 %v492_v48, %s834_s3  ;;  %v541_v38 = vmul.f32 %v489_v21, %v935_v52  ;;  %v540_v44 = vmul.f32 %v489_v21, %v950_v60  ;;  %v553_v41 = vmul.f32 %v489_v21, %v963_v2 }
 0x290   :  { %v552_v50 = vmul.f32 %v489_v21, %v945_v57  ;;  %v565_v43 = vmul.f32 %v489_v21, %v969_v6  ;;  %v564_v47 = vmul.f32 %v489_v21, %v958_v63  ;;  %v491_v57 = vmul.f32 %v489_v21, %v978_v10 }
 0x291   :  { %v490_v55 = vmul.f32 %v489_v21, %v976_v9 }
 0x293   :  { %510 = vrot.lane.b32.xlu0 %v505_v31, %s835_s27  ;;  %508 = vrot.lane.b32.xlu1 %v504_v49, %s835_s27 }
 0x297   :  { %522 = vrot.lane.b32.xlu0 %v517_v46, %s836_s28  ;;  %520 = vrot.lane.b32.xlu1 %v516_v42, %s836_s28 }
 0x29b   :  { %534 = vrot.lane.b32.xlu0 %v529_v35, %s837_s29  ;;  %532 = vrot.lane.b32.xlu1 %v528_v36, %s837_s29 }
 0x29f   :  { %546 = vrot.lane.b32.xlu0 %v541_v38, %s838_s7  ;;  %544 = vrot.lane.b32.xlu1 %v540_v44, %s838_s7 }
 0x2a3   :  { %558 = vrot.lane.b32.xlu0 %v553_v41, %s839_s4  ;;  %556 = vrot.lane.b32.xlu1 %v552_v50, %s839_s4 }
 0x2a7   :  { %570 = vrot.lane.b32.xlu0 %v565_v43, %s840_s8  ;;  %568 = vrot.lane.b32.xlu1 %v564_v47, %s840_s8 }
 0x301   :  { %v499_v52 = vpop.permute.xlu0 %498  ;;  %v497_v54 = vpop.permute.xlu1 %496 }
 0x302   :  { %v503_v59 = vadd.f32 %v499_v52, %v491_v57  ;;  %v502_v6 = vadd.f32 %v497_v54, %v490_v55 }
 0x305   :  { %v511_v60 = vpop.permute.xlu0 %510  ;;  %v509_v51 = vpop.permute.xlu1 %508 }
 0x306   :  { %v515_v61 = vadd.f32 %v511_v60, %v503_v59  ;;  %v514_v63 = vadd.f32 %v509_v51, %v502_v6 }
 0x309   :  { %v523_v53 = vpop.permute.xlu0 %522  ;;  %v521_v2 = vpop.permute.xlu1 %520 }
 0x30a   :  { %v527_v62 = vadd.f32 %v523_v53, %v515_v61  ;;  %v526_v0 = vadd.f32 %v521_v2, %v514_v63 }
 0x30d   :  { %v535_v56 = vpop.permute.xlu0 %534  ;;  %v533_v58 = vpop.permute.xlu1 %532 }
 0x30e   :  { %v539_v4 = vadd.f32 %v535_v56, %v527_v62  ;;  %v538_v5 = vadd.f32 %v533_v58, %v526_v0 }
 0x311   :  { %v547_v1 = vpop.permute.xlu0 %546  ;;  %v545_v3 = vpop.permute.xlu1 %544 }
 0x312   :  { %v551_v11 = vadd.f32 %v547_v1, %v539_v4  ;;  %v550_v12 = vadd.f32 %v545_v3, %v538_v5 }
 0x315   :  { %v559_v7 = vpop.permute.xlu0 %558  ;;  %v557_v8 = vpop.permute.xlu1 %556 }
 0x316   :  { %v563_v13 = vadd.f32 %v559_v7, %v551_v11  ;;  %v562_v10 = vadd.f32 %v557_v8, %v550_v12 }
 0x319   :  { %v571_v14 = vpop.permute.xlu0 %570  ;;  %v569_v9 = vpop.permute.xlu1 %568 }
 0x31a   :  { %v575_v15 = vadd.f32 %v571_v14, %v563_v13  ;;  %v574_v16 = vadd.f32 %v569_v9, %v562_v10 }
 0x31c   :  { %748 = vmatprep.mubr.msk.f32.mxu0 %vm289_vm4, %v574_v16 }
 0x31d   :  { %749 = vmatmul.mubr.msk.f32.vlgmr.msra.gmra.mxu0 %vm289_vm4, %v575_v15 }
 0x3dd   :  { %v750_v24 = vpop.f32.mrf.mxu0 }
 0x3de   :  { %v667_v28 = vmul.f32 %v750_v24, %v708_v18  ;;  %v669_v29 = vmul.f32 %v750_v24, %v710_v19  ;;  %v671_v30 = vmul.f32 %v750_v24, %v712_v20  ;;  %v673_v32 = vmul.f32 %v750_v24, %v714_v22 }
 0x3df   :  { %v648_v33 = vpop.f32.mrf.mxu0 }
 0x3e0   :  { %676 = vst.msk [vmem:[#allocation2 + $0x48] sm:$0xff] %vm387_vm5, %v667_v28  ;;  %678 = vst.msk [vmem:[#allocation2 + $0x58] sm:$0xff] %vm387_vm5, %v669_v29  ;;  %v666_v34 = vmul.f32 %v707_v23, %v648_v33  ;;  %v668_v37 = vmul.f32 %v709_v25, %v648_v33  ;;  %v670_v39 = vmul.f32 %v711_v26, %v648_v33 }
 0x3e1   :  { %680 = vst.msk [vmem:[#allocation2 + $0x68] sm:$0xff] %vm387_vm5, %v671_v30  ;;  %682 = vst.msk [vmem:[#allocation2 + $0x78] sm:$0xff] %vm387_vm5, %v673_v32  ;;  %v672_v40 = vmul.f32 %v713_v27, %v648_v33 }
 0x3e2   :  { %675 = vst.msk [vmem:[#allocation2 + $0x40] sm:$0xff] %vm387_vm5, %v666_v34  ;;  %677 = vst.msk [vmem:[#allocation2 + $0x50] sm:$0xff] %vm387_vm5, %v668_v37 }
 0x3e3   :  { %679 = vst.msk [vmem:[#allocation2 + $0x60] sm:$0xff] %vm387_vm5, %v670_v39  ;;  %681 = vst.msk [vmem:[#allocation2 + $0x70] sm:$0xff] %vm387_vm5, %v672_v40 }
 0x3e4   :  { %810 = shalt.err (!%p807_p4)
}
 0x3e5   :  { %s842_s17 = smov 128   ;;  %s843_s18 = smov 8  }
 0x3e6   :  { %694 = dma.vmem_to_hbm [thread:$0]  %s689_s0, 2048, %s1106_s5, [#allocation3], %s842_s17, %s842_s17, %s843_s18  }
 0x3e7   :  { %819 = dma.done.wait [#allocation3], 2048  }
 0x3e8   :  { %820 = vsyncadd [#allocation3], 4294965248 }
 0x3e9   :  { %698 = vsyncpa [#allocation3], 1 }

</bundles_post_ra>
